<compile_context>
chip_gen: v7x
topology: tpu7x:2x2x1
jax: 0.10.0
libtpu: 0.0.40
codegen_flags: <defaults>
</compile_context>

<pallas_src>
import functools

import jax
import jax.numpy as jnp
from jax.experimental import pallas as pl
from jax.experimental.pallas import tpu as pltpu


def _tile(n, target):
    """Fixed tile (<= target); full extent only when the axis is small."""
    return n if n <= target else target


# ----------------------------------------------------------------------------
# Kernel 1: fused Q/K/V projection over (B*S) row tiles.
#   qkv = x @ W_qkv + b_qkv  (one (TM,D)x(D,3D) MXU op), split in-register.
#   Softmax scale folded into Q. Outputs stored in mxu_dtype (bf16 by default).
# ----------------------------------------------------------------------------
def qkv_kernel(x_ref, w_ref, b_ref, q_ref, k_ref, v_ref, *, dim_model, scale):
    x = x_ref[...].astype(w_ref.dtype)                       # bf16 MXU operand
    qkv = (jnp.dot(x, w_ref[...], preferred_element_type=jnp.float32)
           + b_ref[...])                                     # (TM, 3D) f32
    d = dim_model
    q_ref[...] = (qkv[:, :d] * scale).astype(q_ref.dtype)    # scale folded in
    k_ref[...] = qkv[:, d:2 * d].astype(k_ref.dtype)
    v_ref[...] = qkv[:, 2 * d:3 * d].astype(v_ref.dtype)


# ----------------------------------------------------------------------------
# Kernel 2: scaled dot-product attention, one (pseudo-head, q-tile) per step.
#   Scores computed as a (tq, S) row block (exact softmax over the full row —
#   required anyway to emit alpha). bf16 MXU operands, f32 softmax math,
#   EUP approximate reciprocal for the denominator.
# ----------------------------------------------------------------------------
def attn_kernel(q_ref, k_ref, v_ref, ctx_ref, alpha_ref):
    q = q_ref[0]                                             # (tq, dh), pre-scaled
    k = k_ref[0]                                             # (S,  dh)
    v = v_ref[0]                                             # (S,  dh)
    s = jax.lax.dot_general(q, k, (((1,), (1,)), ((), ())),
                            preferred_element_type=jnp.float32)   # (tq, S)
    s = s - jnp.max(s, axis=-1, keepdims=True)               # stable softmax
    e = jnp.exp(s)
    p = e * pl.reciprocal(jnp.sum(e, axis=-1, keepdims=True), approx=True)
    alpha_ref[0] = p.astype(alpha_ref.dtype)                 # lane-dense (tq, S)
    ctx_ref[0] = jnp.dot(p.astype(v.dtype), v,
                         preferred_element_type=jnp.float32
                         ).astype(ctx_ref.dtype)


# ----------------------------------------------------------------------------
# Kernel 3: output projection + (identity) dropout + residual + LayerNorm,
# over (B*S) row tiles (LayerNorm is per-row, so row tiling is exact).
# ----------------------------------------------------------------------------
def out_ln_kernel(ctx_ref, x_ref, w_ref, b_ref, g_ref, beta_ref, o_ref, *, eps):
    ctx = ctx_ref[...].astype(w_ref.dtype)                   # bf16 MXU operand
    out = (jnp.dot(ctx, w_ref[...], preferred_element_type=jnp.float32)
           + b_ref[...])
    # nn.Dropout in eval mode is the identity (inference semantics).
    out = out + x_ref[...]                                   # residual (f32)
    mean = jnp.mean(out, axis=-1, keepdims=True)
    var = jnp.mean(jnp.square(out - mean), axis=-1, keepdims=True)
    o_ref[...] = ((out - mean) * jax.lax.rsqrt(var + eps)
                  ) * g_ref[...] + beta_ref[...]


# ----------------------------------------------------------------------------
# Wrapper reproducing Multi_Head_Attention.forward
# ----------------------------------------------------------------------------
def multi_head_attention(x, params, num_head, *, eps=1e-5,
                         mxu_dtype=jnp.bfloat16, alpha_dtype=jnp.float32):
    B, S, D = x.shape
    dh = D // num_head
    BS = B * S
    G = B * num_head                    # torch's pseudo-batch (quirky view)
    f32 = jnp.float32
    scale = float(dh) ** (-0.5)

    tm = _tile(BS, 256)                 # row tile for projection / out+LN
    tq = _tile(S, 128)                  # query-row tile for attention

    # Fused QKV weight (D, 3D) and bias (1, 3D); weights pre-transposed so the
    # kernel computes x @ W + b directly, and pre-cast to the MXU dtype.
    w_qkv = jnp.concatenate(
        [params["wq"].T, params["wk"].T, params["wv"].T], axis=1).astype(mxu_dtype)
    b_qkv = jnp.concatenate(
        [params["bq"], params["bk"], params["bv"]]).astype(f32)[None, :]
    w_fc = params["w_fc"].T.astype(mxu_dtype)

    x2d = x.reshape(BS, D).astype(f32)

    # ---- fused Q/K/V projection ---------------------------------------------
    q2d, k2d, v2d = pl.pallas_call(
        functools.partial(qkv_kernel, dim_model=D, scale=scale),
        out_shape=(jax.ShapeDtypeStruct((BS, D), mxu_dtype),) * 3,
        grid=(pl.cdiv(BS, tm),),
        in_specs=[
            pl.BlockSpec((tm, D), lambda i: (i, 0)),          # x rows
            pl.BlockSpec((D, 3 * D), lambda i: (0, 0)),       # W_qkv (resident)
            pl.BlockSpec((1, 3 * D), lambda i: (0, 0)),       # b_qkv
        ],
        out_specs=(pl.BlockSpec((tm, D), lambda i: (i, 0)),) * 3,
        compiler_params=pltpu.CompilerParams(
            dimension_semantics=("parallel",)),
    )(x2d, w_qkv, b_qkv)

    # ---- torch's .view(B*num_head, -1, dim_head): pure metadata reshape -----
    # (contiguous buffers, so these reshapes are free and exactly reproduce
    # the quirky head/row interleave of the reference).
    Qh = q2d.reshape(G, S, dh)
    Kh = k2d.reshape(G, S, dh)
    Vh = v2d.reshape(G, S, dh)

    # ---- scaled dot-product attention: one (pseudo-head, q-tile) per step ----
    ctx, alpha = pl.pallas_call(
        attn_kernel,
        out_shape=(
            jax.ShapeDtypeStruct((G, S, dh), mxu_dtype),
            jax.ShapeDtypeStruct((G, S, S), alpha_dtype),
        ),
        grid=(G, pl.cdiv(S, tq)),
        in_specs=[
            pl.BlockSpec((1, tq, dh), lambda g, qi: (g, qi, 0)),   # Q rows
            pl.BlockSpec((1, S, dh), lambda g, qi: (g, 0, 0)),     # K (full)
            pl.BlockSpec((1, S, dh), lambda g, qi: (g, 0, 0)),     # V (full)
        ],
        out_specs=(
            pl.BlockSpec((1, tq, dh), lambda g, qi: (g, qi, 0)),   # context
            pl.BlockSpec((1, tq, S), lambda g, qi: (g, qi, 0)),    # alpha (lane-dense)
        ),
        compiler_params=pltpu.CompilerParams(
            dimension_semantics=("parallel", "parallel")),
    )(Qh, Kh, Vh)

    # torch's context.view(B, -1, D): free reinterpretation of the same buffer.
    ctx2d = ctx.reshape(BS, D)

    # ---- output projection + residual + LayerNorm -----------------------------
    out2d = pl.pallas_call(
        functools.partial(out_ln_kernel, eps=eps),
        out_shape=jax.ShapeDtypeStruct((BS, D), f32),
        grid=(pl.cdiv(BS, tm),),
        in_specs=[
            pl.BlockSpec((tm, D), lambda i: (i, 0)),          # context rows
            pl.BlockSpec((tm, D), lambda i: (i, 0)),          # x (residual)
            pl.BlockSpec((D, D), lambda i: (0, 0)),           # W_fc^T (resident)
            pl.BlockSpec((1, D), lambda i: (0, 0)),           # b_fc
            pl.BlockSpec((1, D), lambda i: (0, 0)),           # ln gamma
            pl.BlockSpec((1, D), lambda i: (0, 0)),           # ln beta
        ],
        out_specs=pl.BlockSpec((tm, D), lambda i: (i, 0)),
        compiler_params=pltpu.CompilerParams(
            dimension_semantics=("parallel",)),
    )(ctx2d, x2d, w_fc, params["b_fc"].astype(f32)[None, :],
      params["ln_g"].astype(f32)[None, :], params["ln_b"].astype(f32)[None, :])

    out = out2d.reshape(B, S, D)
    return out, alpha


# ----------------------------------------------------------------------------
# Pure-JAX reference (mirrors the PyTorch forward, eval mode, f32 throughout)
# ----------------------------------------------------------------------------
def reference(x, params, num_head):
    B, S, D = x.shape
    dh = D // num_head
    Q = x @ params["wq"].T + params["bq"]
    K = x @ params["wk"].T + params["bk"]
    V = x @ params["wv"].T + params["bv"]
    Qh = Q.reshape(B * num_head, -1, dh)
    Kh = K.reshape(B * num_head, -1, dh)
    Vh = V.reshape(B * num_head, -1, dh)
    scale = dh ** (-0.5)
    att = jnp.einsum("bqd,bkd->bqk", Qh, Kh) * scale
    att = jax.nn.softmax(att, axis=-1)
    ctx = jnp.einsum("bqk,bkd->bqd", att, Vh).reshape(B, -1, dh * num_head)
    out = ctx @ params["w_fc"].T + params["b_fc"]
    out = out + x
    mean = out.mean(-1, keepdims=True)
    var = ((out - mean) ** 2).mean(-1, keepdims=True)
    out = (out - mean) / jnp.sqrt(var + 1e-5) * params["ln_g"] + params["ln_b"]
    return out, att


if __name__ == "__main__":
    B, S, D, H = 2, 8, 32, 4          # batch, seq, dim_model, num_head

    key = jax.random.PRNGKey(0)
    ks = jax.random.split(key, 10)
    init = lambda k, shape: jax.random.uniform(k, shape, jnp.float32, -0.1, 0.1)
    params = {
        "wq": init(ks[0], (D, D)), "bq": init(ks[1], (D,)),
        "wk": init(ks[2], (D, D)), "bk": init(ks[3], (D,)),
        "wv": init(ks[4], (D, D)), "bv": init(ks[5], (D,)),
        "w_fc": init(ks[6], (D, D)), "b_fc": init(ks[7], (D,)),
        "ln_g": jnp.ones((D,), jnp.float32),
        "ln_b": jnp.zeros((D,), jnp.float32),
    }
    x = jax.random.normal(ks[8], (B, S, D), jnp.float32)

    mha = jax.jit(functools.partial(multi_head_attention, num_head=H))
    out, alpha = mha(x, params)
    jax.block_until_ready((out, alpha))

    ref_out, ref_alpha = reference(x, params, H)
    assert out.shape == (B, S, D) and alpha.shape == (B * H, S, S)
    # Tolerances account for bf16 MXU operands + approx-reciprocal softmax.
    assert jnp.allclose(out, ref_out, atol=3e-2, rtol=3e-2)
    assert jnp.allclose(alpha, ref_alpha, atol=2e-2, rtol=2e-2)

    print("KERNEL_OK")
</pallas_src>

<mosaic_0001>
module attributes {stable_mosaic.version = 11 : i64} {
  func.func @qkv_kernel(%arg0: i32, %arg1: memref<16x32xf32, #tpu.memory_space<vmem>>, %arg2: memref<32x96xbf16, #tpu.memory_space<vmem>>, %arg3: memref<1x96xf32, #tpu.memory_space<vmem>>, %arg4: memref<16x32xbf16, #tpu.memory_space<vmem>>, %arg5: memref<16x32xbf16, #tpu.memory_space<vmem>>, %arg6: memref<16x32xbf16, #tpu.memory_space<vmem>>) attributes {dimension_semantics = [#tpu.dimension_semantics<parallel>], iteration_bounds = array<i64: 1>, scalar_prefetch = 0 : i64, scratch_operands = 0 : i64, tpu.core_type = #tpu.core_type<tc>, window_params = [{transform_indices = @transform_0, window_bounds = array<i64: 16, 32>}, {pipeline_mode = #tpu.pipeline_mode<synchronous>, transform_indices = @transform_1, window_bounds = array<i64: 32, 96>}, {pipeline_mode = #tpu.pipeline_mode<synchronous>, transform_indices = @transform_2, window_bounds = array<i64: 1, 96>}, {transform_indices = @transform_3, window_bounds = array<i64: 16, 32>}, {transform_indices = @transform_4, window_bounds = array<i64: 16, 32>}, {transform_indices = @transform_5, window_bounds = array<i64: 16, 32>}]} {
    %c0 = arith.constant 0 : index
    %c0_0 = arith.constant 0 : index
    %0 = vector.load %arg1[%c0, %c0_0] : memref<16x32xf32, #tpu.memory_space<vmem>>, vector<16x32xf32>
    %1 = arith.truncf %0 : vector<16x32xf32> to vector<16x32xbf16>
    %c0_1 = arith.constant 0 : index
    %c0_2 = arith.constant 0 : index
    %2 = vector.load %arg2[%c0_1, %c0_2] : memref<32x96xbf16, #tpu.memory_space<vmem>>, vector<32x96xbf16>
    %cst = arith.constant dense<0.000000e+00> : vector<16x96xf32>
    %3 = tpu.matmul %1, %2, %cst {dimension_numbers = #tpu.dot_dimension_numbers<[1], [0], [0], [1], [0, 0, 1, 1], [], []>} : vector<16x32xbf16>, vector<32x96xbf16>, vector<16x96xf32> -> vector<16x96xf32>
    %c0_3 = arith.constant 0 : index
    %c0_4 = arith.constant 0 : index
    %4 = vector.load %arg3[%c0_3, %c0_4] : memref<1x96xf32, #tpu.memory_space<vmem>>, vector<1x96xf32>
    %5 = vector.broadcast %4 : vector<1x96xf32> to vector<16x96xf32>
    %6 = arith.addf %3, %5 : vector<16x96xf32>
    %7 = vector.extract_strided_slice %6 {offsets = [0, 0], sizes = [16, 32], strides = [1, 1]} : vector<16x96xf32> to vector<16x32xf32>
    %cst_5 = arith.constant 0.353553385 : f32
    %8 = vector.broadcast %cst_5 : f32 to vector<16x32xf32>
    %9 = arith.mulf %7, %8 : vector<16x32xf32>
    %10 = arith.truncf %9 : vector<16x32xf32> to vector<16x32xbf16>
    %c0_6 = arith.constant 0 : index
    %c0_7 = arith.constant 0 : index
    %11 = vector.load %arg4[%c0_6, %c0_7] : memref<16x32xbf16, #tpu.memory_space<vmem>>, vector<16x32xbf16>
    tpu.vector_store %arg4[%c0_6, %c0_7], %10 {strides = array<i32>} : memref<16x32xbf16, #tpu.memory_space<vmem>>, vector<16x32xbf16>,
    %12 = vector.extract_strided_slice %6 {offsets = [0, 32], sizes = [16, 32], strides = [1, 1]} : vector<16x96xf32> to vector<16x32xf32>
    %13 = arith.truncf %12 : vector<16x32xf32> to vector<16x32xbf16>
    %c0_8 = arith.constant 0 : index
    %c0_9 = arith.constant 0 : index
    %14 = vector.load %arg5[%c0_8, %c0_9] : memref<16x32xbf16, #tpu.memory_space<vmem>>, vector<16x32xbf16>
    tpu.vector_store %arg5[%c0_8, %c0_9], %13 {strides = array<i32>} : memref<16x32xbf16, #tpu.memory_space<vmem>>, vector<16x32xbf16>,
    %15 = vector.extract_strided_slice %6 {offsets = [0, 64], sizes = [16, 32], strides = [1, 1]} : vector<16x96xf32> to vector<16x32xf32>
    %16 = arith.truncf %15 : vector<16x32xf32> to vector<16x32xbf16>
    %c0_10 = arith.constant 0 : index
    %c0_11 = arith.constant 0 : index
    %17 = vector.load %arg6[%c0_10, %c0_11] : memref<16x32xbf16, #tpu.memory_space<vmem>>, vector<16x32xbf16>
    tpu.vector_store %arg6[%c0_10, %c0_11], %16 {strides = array<i32>} : memref<16x32xbf16, #tpu.memory_space<vmem>>, vector<16x32xbf16>,
    return
  }
  func.func @transform_0(%arg0: i32) -> (i32, i32) {
    %c0_i32 = arith.constant 0 : i32
    %c0_i32_0 = arith.constant 0 : i32
    return %arg0, %c0_i32 : i32, i32
  }
  func.func @transform_1(%arg0: i32) -> (i32, i32) {
    %c0_i32 = arith.constant 0 : i32
    %c0_i32_0 = arith.constant 0 : i32
    %c0_i32_1 = arith.constant 0 : i32
    return %c0_i32, %c0_i32_0 : i32, i32
  }
  func.func @transform_2(%arg0: i32) -> (i32, i32) {
    %c0_i32 = arith.constant 0 : i32
    %c0_i32_0 = arith.constant 0 : i32
    %c0_i32_1 = arith.constant 0 : i32
    return %c0_i32, %c0_i32_0 : i32, i32
  }
  func.func @transform_3(%arg0: i32) -> (i32, i32) {
    %c0_i32 = arith.constant 0 : i32
    %c0_i32_0 = arith.constant 0 : i32
    return %arg0, %c0_i32 : i32, i32
  }
  func.func @transform_4(%arg0: i32) -> (i32, i32) {
    %c0_i32 = arith.constant 0 : i32
    %c0_i32_0 = arith.constant 0 : i32
    return %arg0, %c0_i32 : i32, i32
  }
  func.func @transform_5(%arg0: i32) -> (i32, i32) {
    %c0_i32 = arith.constant 0 : i32
    %c0_i32_0 = arith.constant 0 : i32
    return %arg0, %c0_i32 : i32, i32
  }
}

module attributes {stable_mosaic.version = 11 : i64} {
  func.func @attn_kernel(%arg0: i32, %arg1: i32, %arg2: memref<1x8x8xbf16, #tpu.memory_space<vmem>>, %arg3: memref<1x8x8xbf16, #tpu.memory_space<vmem>>, %arg4: memref<1x8x8xbf16, #tpu.memory_space<vmem>>, %arg5: memref<1x8x8xbf16, #tpu.memory_space<vmem>>, %arg6: memref<1x8x8xf32, #tpu.memory_space<vmem>>) attributes {dimension_semantics = [#tpu.dimension_semantics<parallel>, #tpu.dimension_semantics<parallel>], iteration_bounds = array<i64: 8, 1>, scalar_prefetch = 0 : i64, scratch_operands = 0 : i64, tpu.core_type = #tpu.core_type<tc>, window_params = [{transform_indices = @transform_0, window_bounds = array<i64: 1, 8, 8>}, {transform_indices = @transform_1, window_bounds = array<i64: 1, 8, 8>}, {transform_indices = @transform_2, window_bounds = array<i64: 1, 8, 8>}, {transform_indices = @transform_3, window_bounds = array<i64: 1, 8, 8>}, {transform_indices = @transform_4, window_bounds = array<i64: 1, 8, 8>}]} {
    %c0 = arith.constant 0 : index
    %c0_0 = arith.constant 0 : index
    %c0_1 = arith.constant 0 : index
    %0 = vector.load %arg2[%c0, %c0_0, %c0_1] : memref<1x8x8xbf16, #tpu.memory_space<vmem>>, vector<1x8x8xbf16>
    %1 = vector.shape_cast %0 : vector<1x8x8xbf16> to vector<8x8xbf16>
    %c0_2 = arith.constant 0 : index
    %c0_3 = arith.constant 0 : index
    %c0_4 = arith.constant 0 : index
    %2 = vector.load %arg3[%c0_2, %c0_3, %c0_4] : memref<1x8x8xbf16, #tpu.memory_space<vmem>>, vector<1x8x8xbf16>
    %3 = vector.shape_cast %2 : vector<1x8x8xbf16> to vector<8x8xbf16>
    %c0_5 = arith.constant 0 : index
    %c0_6 = arith.constant 0 : index
    %c0_7 = arith.constant 0 : index
    %4 = vector.load %arg4[%c0_5, %c0_6, %c0_7] : memref<1x8x8xbf16, #tpu.memory_space<vmem>>, vector<1x8x8xbf16>
    %5 = vector.shape_cast %4 : vector<1x8x8xbf16> to vector<8x8xbf16>
    %cst = arith.constant dense<0.000000e+00> : vector<8x8xf32>
    %6 = tpu.matmul %1, %3, %cst {dimension_numbers = #tpu.dot_dimension_numbers<[1], [1], [0], [0], [0, 0, 1, 0], [], []>} : vector<8x8xbf16>, vector<8x8xbf16>, vector<8x8xf32> -> vector<8x8xf32>
    %cst_8 = arith.constant dense<0xFF800000> : vector<8xf32>
    %7 = vector.multi_reduction <maximumf>, %6, %cst_8 [1] : vector<8x8xf32> to vector<8xf32>
    %8 = vector.shape_cast %7 : vector<8xf32> to vector<8x1xf32>
    %9 = vector.broadcast %8 : vector<8x1xf32> to vector<8x8xf32>
    %10 = arith.subf %6, %9 : vector<8x8xf32>
    %11 = math.exp %10 : vector<8x8xf32>
    %cst_9 = arith.constant dense<0.000000e+00> : vector<8xf32>
    %12 = vector.multi_reduction <add>, %11, %cst_9 [1] : vector<8x8xf32> to vector<8xf32>
    %13 = vector.shape_cast %12 : vector<8xf32> to vector<8x1xf32>
    %14 = tpu.reciprocal %13 {approx = true} : vector<8x1xf32> -> vector<8x1xf32>
    %15 = vector.broadcast %14 : vector<8x1xf32> to vector<8x8xf32>
    %16 = arith.mulf %11, %15 : vector<8x8xf32>
    %c0_10 = arith.constant 0 : index
    %c0_11 = arith.constant 0 : index
    %c0_12 = arith.constant 0 : index
    %17 = vector.load %arg6[%c0_10, %c0_11, %c0_12] : memref<1x8x8xf32, #tpu.memory_space<vmem>>, vector<1x8x8xf32>
    %18 = vector.shape_cast %17 : vector<1x8x8xf32> to vector<8x8xf32>
    %19 = vector.shape_cast %16 : vector<8x8xf32> to vector<1x8x8xf32>
    tpu.vector_store %arg6[%c0_10, %c0_11, %c0_12], %19 {strides = array<i32>} : memref<1x8x8xf32, #tpu.memory_space<vmem>>, vector<1x8x8xf32>,
    %20 = arith.truncf %16 : vector<8x8xf32> to vector<8x8xbf16>
    %cst_13 = arith.constant dense<0.000000e+00> : vector<8x8xf32>
    %21 = tpu.matmul %20, %5, %cst_13 {dimension_numbers = #tpu.dot_dimension_numbers<[1], [0], [0], [1], [0, 0, 1, 1], [], []>} : vector<8x8xbf16>, vector<8x8xbf16>, vector<8x8xf32> -> vector<8x8xf32>
    %22 = arith.truncf %21 : vector<8x8xf32> to vector<8x8xbf16>
    %c0_14 = arith.constant 0 : index
    %c0_15 = arith.constant 0 : index
    %c0_16 = arith.constant 0 : index
    %23 = vector.load %arg5[%c0_14, %c0_15, %c0_16] : memref<1x8x8xbf16, #tpu.memory_space<vmem>>, vector<1x8x8xbf16>
    %24 = vector.shape_cast %23 : vector<1x8x8xbf16> to vector<8x8xbf16>
    %25 = vector.shape_cast %22 : vector<8x8xbf16> to vector<1x8x8xbf16>
    tpu.vector_store %arg5[%c0_14, %c0_15, %c0_16], %25 {strides = array<i32>} : memref<1x8x8xbf16, #tpu.memory_space<vmem>>, vector<1x8x8xbf16>,
    return
  }
  func.func @transform_0(%arg0: i32, %arg1: i32) -> (i32, i32, i32) {
    %c0_i32 = arith.constant 0 : i32
    %c0_i32_0 = arith.constant 0 : i32
    return %arg0, %arg1, %c0_i32 : i32, i32, i32
  }
  func.func @transform_1(%arg0: i32, %arg1: i32) -> (i32, i32, i32) {
    %c0_i32 = arith.constant 0 : i32
    %c0_i32_0 = arith.constant 0 : i32
    %c0_i32_1 = arith.constant 0 : i32
    return %arg0, %c0_i32, %c0_i32_0 : i32, i32, i32
  }
  func.func @transform_2(%arg0: i32, %arg1: i32) -> (i32, i32, i32) {
    %c0_i32 = arith.constant 0 : i32
    %c0_i32_0 = arith.constant 0 : i32
    %c0_i32_1 = arith.constant 0 : i32
    return %arg0, %c0_i32, %c0_i32_0 : i32, i32, i32
  }
  func.func @transform_3(%arg0: i32, %arg1: i32) -> (i32, i32, i32) {
    %c0_i32 = arith.constant 0 : i32
    %c0_i32_0 = arith.constant 0 : i32
    return %arg0, %arg1, %c0_i32 : i32, i32, i32
  }
  func.func @transform_4(%arg0: i32, %arg1: i32) -> (i32, i32, i32) {
    %c0_i32 = arith.constant 0 : i32
    %c0_i32_0 = arith.constant 0 : i32
    return %arg0, %arg1, %c0_i32 : i32, i32, i32
  }
}

module attributes {stable_mosaic.version = 11 : i64} {
  func.func @out_ln_kernel(%arg0: i32, %arg1: memref<16x32xbf16, #tpu.memory_space<vmem>>, %arg2: memref<16x32xf32, #tpu.memory_space<vmem>>, %arg3: memref<32x32xbf16, #tpu.memory_space<vmem>>, %arg4: memref<1x32xf32, #tpu.memory_space<vmem>>, %arg5: memref<1x32xf32, #tpu.memory_space<vmem>>, %arg6: memref<1x32xf32, #tpu.memory_space<vmem>>, %arg7: memref<16x32xf32, #tpu.memory_space<vmem>>) attributes {dimension_semantics = [#tpu.dimension_semantics<parallel>], iteration_bounds = array<i64: 1>, scalar_prefetch = 0 : i64, scratch_operands = 0 : i64, tpu.core_type = #tpu.core_type<tc>, window_params = [{transform_indices = @transform_0, window_bounds = array<i64: 16, 32>}, {transform_indices = @transform_1, window_bounds = array<i64: 16, 32>}, {pipeline_mode = #tpu.pipeline_mode<synchronous>, transform_indices = @transform_2, window_bounds = array<i64: 32, 32>}, {pipeline_mode = #tpu.pipeline_mode<synchronous>, transform_indices = @transform_3, window_bounds = array<i64: 1, 32>}, {pipeline_mode = #tpu.pipeline_mode<synchronous>, transform_indices = @transform_4, window_bounds = array<i64: 1, 32>}, {pipeline_mode = #tpu.pipeline_mode<synchronous>, transform_indices = @transform_5, window_bounds = array<i64: 1, 32>}, {transform_indices = @transform_6, window_bounds = array<i64: 16, 32>}]} {
    %c0 = arith.constant 0 : index
    %c0_0 = arith.constant 0 : index
    %0 = vector.load %arg1[%c0, %c0_0] : memref<16x32xbf16, #tpu.memory_space<vmem>>, vector<16x32xbf16>
    %c0_1 = arith.constant 0 : index
    %c0_2 = arith.constant 0 : index
    %1 = vector.load %arg3[%c0_1, %c0_2] : memref<32x32xbf16, #tpu.memory_space<vmem>>, vector<32x32xbf16>
    %cst = arith.constant dense<0.000000e+00> : vector<16x32xf32>
    %2 = tpu.matmul %0, %1, %cst {dimension_numbers = #tpu.dot_dimension_numbers<[1], [0], [0], [1], [0, 0, 1, 1], [], []>} : vector<16x32xbf16>, vector<32x32xbf16>, vector<16x32xf32> -> vector<16x32xf32>
    %c0_3 = arith.constant 0 : index
    %c0_4 = arith.constant 0 : index
    %3 = vector.load %arg4[%c0_3, %c0_4] : memref<1x32xf32, #tpu.memory_space<vmem>>, vector<1x32xf32>
    %4 = vector.broadcast %3 : vector<1x32xf32> to vector<16x32xf32>
    %5 = arith.addf %2, %4 : vector<16x32xf32>
    %c0_5 = arith.constant 0 : index
    %c0_6 = arith.constant 0 : index
    %6 = vector.load %arg2[%c0_5, %c0_6] : memref<16x32xf32, #tpu.memory_space<vmem>>, vector<16x32xf32>
    %7 = arith.addf %5, %6 : vector<16x32xf32>
    %cst_7 = arith.constant dense<0.000000e+00> : vector<16xf32>
    %8 = vector.multi_reduction <add>, %7, %cst_7 [1] : vector<16x32xf32> to vector<16xf32>
    %9 = vector.shape_cast %8 : vector<16xf32> to vector<16x1xf32>
    %cst_8 = arith.constant 3.200000e+01 : f32
    %10 = vector.broadcast %cst_8 : f32 to vector<16x1xf32>
    %11 = arith.divf %9, %10 : vector<16x1xf32>
    %12 = vector.broadcast %11 : vector<16x1xf32> to vector<16x32xf32>
    %13 = arith.subf %7, %12 : vector<16x32xf32>
    %14 = arith.mulf %13, %13 : vector<16x32xf32>
    %cst_9 = arith.constant dense<0.000000e+00> : vector<16xf32>
    %15 = vector.multi_reduction <add>, %14, %cst_9 [1] : vector<16x32xf32> to vector<16xf32>
    %16 = vector.shape_cast %15 : vector<16xf32> to vector<16x1xf32>
    %cst_10 = arith.constant 3.200000e+01 : f32
    %17 = vector.broadcast %cst_10 : f32 to vector<16x1xf32>
    %18 = arith.divf %16, %17 : vector<16x1xf32>
    %19 = vector.broadcast %11 : vector<16x1xf32> to vector<16x32xf32>
    %20 = arith.subf %7, %19 : vector<16x32xf32>
    %cst_11 = arith.constant 9.99999974E-6 : f32
    %21 = vector.broadcast %cst_11 : f32 to vector<16x1xf32>
    %22 = arith.addf %18, %21 : vector<16x1xf32>
    %23 = math.rsqrt %22 : vector<16x1xf32>
    %24 = vector.broadcast %23 : vector<16x1xf32> to vector<16x32xf32>
    %25 = arith.mulf %20, %24 : vector<16x32xf32>
    %c0_12 = arith.constant 0 : index
    %c0_13 = arith.constant 0 : index
    %26 = vector.load %arg5[%c0_12, %c0_13] : memref<1x32xf32, #tpu.memory_space<vmem>>, vector<1x32xf32>
    %27 = vector.broadcast %26 : vector<1x32xf32> to vector<16x32xf32>
    %28 = arith.mulf %25, %27 : vector<16x32xf32>
    %c0_14 = arith.constant 0 : index
    %c0_15 = arith.constant 0 : index
    %29 = vector.load %arg6[%c0_14, %c0_15] : memref<1x32xf32, #tpu.memory_space<vmem>>, vector<1x32xf32>
    %30 = vector.broadcast %29 : vector<1x32xf32> to vector<16x32xf32>
    %31 = arith.addf %28, %30 : vector<16x32xf32>
    %c0_16 = arith.constant 0 : index
    %c0_17 = arith.constant 0 : index
    %32 = vector.load %arg7[%c0_16, %c0_17] : memref<16x32xf32, #tpu.memory_space<vmem>>, vector<16x32xf32>
    tpu.vector_store %arg7[%c0_16, %c0_17], %31 {strides = array<i32>} : memref<16x32xf32, #tpu.memory_space<vmem>>, vector<16x32xf32>,
    return
  }
  func.func @transform_0(%arg0: i32) -> (i32, i32) {
    %c0_i32 = arith.constant 0 : i32
    %c0_i32_0 = arith.constant 0 : i32
    return %arg0, %c0_i32 : i32, i32
  }
  func.func @transform_1(%arg0: i32) -> (i32, i32) {
    %c0_i32 = arith.constant 0 : i32
    %c0_i32_0 = arith.constant 0 : i32
    return %arg0, %c0_i32 : i32, i32
  }
  func.func @transform_2(%arg0: i32) -> (i32, i32) {
    %c0_i32 = arith.constant 0 : i32
    %c0_i32_0 = arith.constant 0 : i32
    %c0_i32_1 = arith.constant 0 : i32
    return %c0_i32, %c0_i32_0 : i32, i32
  }
  func.func @transform_3(%arg0: i32) -> (i32, i32) {
    %c0_i32 = arith.constant 0 : i32
    %c0_i32_0 = arith.constant 0 : i32
    %c0_i32_1 = arith.constant 0 : i32
    return %c0_i32, %c0_i32_0 : i32, i32
  }
  func.func @transform_4(%arg0: i32) -> (i32, i32) {
    %c0_i32 = arith.constant 0 : i32
    %c0_i32_0 = arith.constant 0 : i32
    %c0_i32_1 = arith.constant 0 : i32
    return %c0_i32, %c0_i32_0 : i32, i32
  }
  func.func @transform_5(%arg0: i32) -> (i32, i32) {
    %c0_i32 = arith.constant 0 : i32
    %c0_i32_0 = arith.constant 0 : i32
    %c0_i32_1 = arith.constant 0 : i32
    return %c0_i32, %c0_i32_0 : i32, i32
  }
  func.func @transform_6(%arg0: i32) -> (i32, i32) {
    %c0_i32 = arith.constant 0 : i32
    %c0_i32_0 = arith.constant 0 : i32
    return %arg0, %c0_i32 : i32, i32
  }
}

</mosaic_0001>

<bundles_post_ra>
// kernel: multi_head_attention.3
= control target key start
LH: loop header
LB: loop body
LE: loop exit
PB: predicated region body
PF: predicated region fallthrough
CT: control target
= control target key end

     0   :  { %v165_v0 = vmov 0.0   ;;  %vm166_vm0 = vmmov 0   ;;  %vm44_vm1 = vcmask 261120   ;;  %vm99_vm2 = vcmask 257024   ;;  %s238_s1 = inlined_call_operand.vmem [shape: bf16[32,96], index: 1, kind: input, shape index: {}]   ;;  %s239_s0 = inlined_call_operand.vmem [shape: f32[16,32], index: 0, kind: input, shape index: {}]   ;;  %s240_s2 = inlined_call_operand.vmem [shape: f32[1,96], index: 2, kind: input, shape index: {}]   ;;  %s241_s3 = inlined_call_operand.vmem [shape: bf16[16,32], index: 3, kind: output, shape index: {0}]   ;;  %s242_s5 = inlined_call_operand.vmem [shape: bf16[16,32], index: 5, kind: output, shape index: {2}]   ;;  %s243_s4 = inlined_call_operand.vmem [shape: bf16[16,32], index: 4, kind: output, shape index: {1}]  }
   0x1   :  { %151 = vmatprep.subr.bf16.mxu0 %v165_v0  ;;  %v163_v1 = vld [vmem:[%s238_s1] sm:$0xff]   ;;  %155 = vmatprep.mubr.msk.bf16.mxu0 %vm166_vm0, %v165_v0  ;;  %v164_v2 = vld [vmem:[%s238_s1 + $0x8] sm:$0xff]   ;;  %s168_s1 = smov 96  }
   0x2   :  { %152 = vmatpush3.bf16.msra.mxu0 %v163_v1  ;;  %v18_v3 = vld [vmem:[%s239_s0] sm:$0xff]  ;;  %v19_v4 = vld [vmem:[%s239_s0 + $0x8] sm:$0xff]  ;;  %s167_s0 = smov 64  }
   0x3   :  { %153 = vmatprep.subr.bf16.mxu0 %v165_v0  ;;  %v20_v5 = vpack.c.bf16 %v19_v4, %v18_v3  ;;  %v136_v6 = vld [vmem:[%s240_s2] ss:$0 sm:$0xff] }
   0x6   :  { %154 = vmatpush3.bf16.msra.mxu0 %v164_v2 }
   0x9   :  { %156 = vmatmul.mubr.msk.bf16.vlgmr.msra.gmra.mrb[0].mxu0 %vm44_vm1, %v20_v5 }
  0xdc   :  { %v82_v7 = vpop.f32.mrb[0].mxu0 }
  0xdd   :  { %v83_v8 = vadd.f32 %v136_v6, %v82_v7  ;;  %v157_v9 = vpop.f32.mrb[1].mxu0 }
  0xde   :  { %v85_v10 = vpop.f32.mrb[2].mxu0 }
  0xdf   :  { %v89_v11 = vmul.f32 0.35355338, %v83_v8  ;;  %v86_v12 = vadd.f32 %v136_v6, %v85_v10  ;;  %v158_v13 = vpop.f32.mrb[3].mxu0  ;;  %v146_v14 = vpack.c.bf16 %v83_v8, %v83_v8 }
  0xe1   :  { %v144_v15 = vpack.c.bf16 %v89_v11, %v89_v11  ;;  %v90_v16 = vmul.f32 0.35355338, %v86_v12  ;;  %116 = vrot.lane.b32.xlu1 %v146_v14, %s167_s0  ;;  %108 = vrot.lane.b32.xlu0 %v146_v14, %s168_s1  ;;  %v147_v18 = vpack.c.bf16 %v86_v12, %v86_v12 }
  0xe3   :  { %100 = vst.msk [vmem:[%s241_s3] sm:$0xf] %vm99_vm2, %v144_v15  ;;  %v145_v17 = vpack.c.bf16 %v90_v16, %v90_v16 }
  0xe5   :  { %101 = vst.msk [vmem:[%s241_s3 + $0x4] sm:$0xf] %vm99_vm2, %v145_v17  ;;  %118 = vrot.lane.b32.xlu1 %v147_v18, %s167_s0  ;;  %110 = vrot.lane.b32.xlu0 %v147_v18, %s168_s1 }
 0x153   :  { %v117_v19 = vpop.permute.xlu1 %116  ;;  %v109_v20 = vpop.permute.xlu0 %108 }
 0x154   :  { %122 = vst.msk [vmem:[%s242_s5] sm:$0xf] %vm99_vm2, %v117_v19  ;;  %114 = vst.msk [vmem:[%s243_s4] sm:$0xf] %vm99_vm2, %v109_v20 }
 0x157   :  { %v119_v21 = vpop.permute.xlu1 %118  ;;  %v111_v22 = vpop.permute.xlu0 %110 }
 0x158   :  { %123 = vst.msk [vmem:[%s242_s5 + $0x4] sm:$0xf] %vm99_vm2, %v119_v21  ;;  %115 = vst.msk [vmem:[%s243_s4 + $0x4] sm:$0xf] %vm99_vm2, %v111_v22 }

// kernel: multi_head_attention.4
= control target key start
LH: loop header
LB: loop body
LE: loop exit
PB: predicated region body
PF: predicated region fallthrough
CT: control target
= control target key end

     0   :  { %10 = vsyncpa [#allocation3], 0  ;;  %s864_s0 = inlined_call_operand.vmem [shape: bf16[8,8,8], index: 0, kind: input, shape index: {}]   ;;  %s865_s1 = inlined_call_operand.vmem [shape: bf16[8,8,8], index: 1, kind: input, shape index: {}]   ;;  %s866_s2 = inlined_call_operand.vmem [shape: bf16[8,8,8], index: 2, kind: input, shape index: {}]   ;;  %s867_s3 = inlined_call_operand.vmem [shape: bf16[8,8,8], index: 3, kind: output, shape index: {0}]   ;;  %s868_s4 = inlined_call_operand.hbm [shape: f32[8,8,8], index: 4, kind: output, shape index: {1}]  }
   0x1   :  { %12 = vsyncpa [#allocation3 + $0x1], 0  ;;  %s737_s15 = smov 0   ;;  %s739_s16 = smov 0  }
   0x2   :  { %s741_s17 = smov 0   ;;  %s743_s18 = smov 0  }
   0x3   :  { %s745_s19 = smov 0   ;;  %s747_s20 = smov 0  }
   0x4 LB: > { %s536_s21 = sadd.s32 4294967295, %s707_s20   ;;  %s537_s22 = sadd.s32 4294967294, %s707_s20   ;;  %s707_s20 = sphi %s747_s20, %s18_s20   ;;  %s703_s19 = sphi %s745_s19, %s875_s19   ;;  %s699_s18 = sphi %s743_s18, %s874_s18   ;;  %s695_s17 = sphi %s741_s17, %s873_s17   ;;  %s691_s16 = sphi %s739_s16, %s872_s16   ;;  %s687_s15 = sphi %s737_s15, %s871_s15  }
   0x5   : > { %s30_s23 = sadd.s32 1, %s703_s19  ;;  %s147_s24 = sadd.s32 1, %s695_s17 }
   0x6   : > { %p32_p0 = scmp.ge.s32.totalorder %s30_s23, 8  ;;  %p157_p1 = scmp.ne.s32.totalorder %s695_s17, %s691_s16 }
   0x7   : > { %p158_p2 = scmp.eq.s32.totalorder %s536_s21, 7  ;;  %p163_p3 = scmp.ne.s32.totalorder %s691_s16, %s687_s15 }
   0x8   : > { %s877_s23 = smov (%p32_p0, %s30_s23), 0  ;;  %p164_p5 = scmp.eq.s32.totalorder %s537_s22, 7 }
   0x9   : > { %p777_p4 = por %p158_p2, %p157_p1  ;;  %s142_s26 = ssub.s32 %s703_s19, %s877_s23 }
   0xa   : > { %p540_p6 = scmp.ge.s32.totalorder %s707_s20, 1  ;;  %p145_p7 = scmp.eq.s32.totalorder %s142_s26, 0 }
   0xb   : > { %p784_p8 = por %p164_p5, %p163_p3  ;;  %p206_p9 = scmp.lt.s32.totalorder %s707_s20, 9 }
   0xc   : > { %s790_s28 = scalar_select %p145_p7, %s695_s17, %s147_s24  }
   0xd   : > { %p207_p10 = pnand %p540_p6, %p206_p9 }
   0xe   : > { %p249_p11 = scmp.lt.s32.totalorder (!%p207_p10), %s699_s18, 7  ;;  %v709_v0 = vmov (!%p207_p10), 0.0   ;;  %vm710_vm0 = vmmov (!%p207_p10), 0   ;;  %vm275_vm1 = vcmask (!%p207_p10), 64512   ;;  %vm338_vm2 = vcmask (!%p207_p10), 1043456   ;;  %s246_s14 = sand.u32 (!%p207_p10), 1, %s691_s16  }
   0xf   : > { %210 = sbr.rel (%p207_p10) target bundleno = 778 (0x30a), region = 32  ;;  %556 = vmatprep.subr.bf16.mxu0 (!%p207_p10), %v709_v0  ;;  %558 = vmatprep.mubr.msk.bf16.mxu0 (!%p207_p10), %vm710_vm0, %v709_v0  ;;  %s541_s21 = sshll.u32 (!%p207_p10), %s246_s14, 3 }
  0x10   : > { %562 = vmatprep.subr.bf16.mxu1 (!%p207_p10), %v709_v0  ;;  %564 = vmatprep.mubr.msk.bf16.mxu1 (!%p207_p10), %vm710_vm0, %v709_v0  ;;  %s248_s22 = scalar_lea.vmem (!%p207_p10), [#allocation2], %s541_s21  ;;  %s549_s24 = sshll.u32 (!%p207_p10), %s699_s18, 7 }
  0x11   : > { %s410_s26 = sshll.u32 (!%p207_p10), %s248_s22, 4  ;;  %s819_s6 = scalar_lea.hbm (!%p207_p10), %s868_s4, %s549_s24  ;;  %s411_s26 = int_to_ptr.vmem [resolvable:$true] %s410_s26 }
  0x12   : > { %s629_s8 = scalar_lea.vmem (!%p207_p10), %s411_s26, 128  ;;  %s711_s9 = smov (!%p207_p10), [#allocation2]  }
  0x13   : > { %p630_p12 = scmp.ne.s32.totalorder (!%p207_p10), %s411_s26, %s629_s8 }
  0x15   : > { %p631_p13 = pnand (!%p207_p10), %p630_p12, %p777_p4 }
  0x16   : > { %s250_s29 = scalar_select %p249_p11, %s699_s18, 7 }
  0x17   : > { %p632_p0 = pneg %p631_p13 }
  0x18   : > { %s794_s30 = sshll.u32 %s250_s29, 2 }
  0x19   : > { %s259_s7 = scalar_lea.vmem %s865_s1, %s794_s30  ;;  %s255_s10 = scalar_lea.vmem %s864_s0, %s794_s30 }
  0x1a   : > { %v273_v1 = vld [vmem:[%s259_s7] sm:$0xf]  ;;  %s263_s13 = scalar_lea.vmem %s866_s2, %s794_s30  ;;  %s393_s7 = scalar_lea.sflag [#allocation3], %s246_s14 }
  0x1b   : > { %v280_v2 = vsel %vm275_vm1, %v273_v1, 0  ;;  %v272_v3 = vld [vmem:[%s255_s10] sm:$0xf]  ;;  %s633_s10 = sshll.u32 %s711_s9, 4  ;;  %s634_s10 = int_to_ptr.vmem [resolvable:$false] %s633_s10 }
  0x1c   : > { %557 = vmatpush3.bf16.xpose.msra.mxu0 %v280_v2  ;;  %v274_v14 = vld [vmem:[%s263_s13] sm:$0xf]  ;;  %s635_s11 = scalar_lea.vmem %s634_s10, 256  ;;  %p636_p1 = scmp.lt.s32.totalorder %s411_s26, %s634_s10 }
  0x1d   : > { %v340_v15 = vsel %vm338_vm2, %v274_v14, 0  ;;  %p637_p2 = scmp.lt.s32.totalorder %s635_s11, %s629_s8 }
  0x1e   : > { %563 = vmatpush3.bf16.msra.mxu1 %v340_v15 }
  0x1f   : > { %p638_p3 = por %p637_p2, %p636_p1 }
  0x21   : > { %p639_p5 = pnand %p638_p3, %p632_p0 }
  0x23   : > { %559 = vmatmul.mubr.msk.bf16.vlgmr.msra.gmra.mrb[0].mxu0 %vm275_vm1, %v272_v3 }
  0xf6   : > { %v316_v4 = vpop.f32.mrb[0].mxu0 }
  0xf7   : > { %v560_v5 = vpop.f32.mrb[1].mxu0  ;;  %v322_v6 = vsel %vm275_vm1, %v316_v4, -inf }
  0xf8   : > { %323 = vmax.xlane.f32.xlu0 %v322_v6  ;;  %v319_v7 = vpop.f32.mrb[2].mxu0 }
  0xf9   : > { %v561_v8 = vpop.f32.mrb[3].mxu0 }
 0x185   : > { %v324_v9 = vpop.xlane.xlu0 %323 }
 0x186   : > { %v325_v10 = vsub.f32 %v316_v4, %v324_v9 }
 0x188   : > { %v326_v11 = vmul.f32 1.442695, %v325_v10 }
 0x18a   : > { %625 = vpow2.f32 %v326_v11 }
 0x194   : > { %v626_v12 = vpop.eup %625 }
 0x195   : > { %v328_v13 = vsel %vm275_vm1, %v626_v12, 0.0 }
 0x196   : > { %329 = vadd.xlane.f32.xlu0 %v328_v13 }
 0x223   : > { %v330_v16 = vpop.xlane.xlu0 %329 }
 0x224   : > { %627 = vrcp.f32 %v330_v16 }
 0x22e   : > { %v628_v17 = vpop.eup %627 }
 0x22f   : > { %v332_v18 = vmul.f32 %v628_v17, %v626_v12 }
 0x231   : > { %v334_v19 = vpack.c.bf16 %v332_v18, %v332_v18  ;;  %333 = vst.msk [vmem:[%s248_s22] sm:$0xff] %vm275_vm1, %v332_v18 }
 0x233   : > { %565 = vmatmul.mubr.msk.bf16.vlgmr.msra.gmra.mrb[0].mxu1 %vm275_vm1, %v334_v19 }
 0x234   : > { %642 = shalt.err (!%p639_p5)
}
 0x235   : > { %s643_s18 = scalar_lea.hbm %s819_s6, 128  ;;  %s647_s14 = scalar_lea.hbm %s868_s4, 1024 }
 0x236   : > { %p644_p6 = scmp.ne.s32.totalorder %s819_s6, %s643_s18  ;;  %p648_p10 = scmp.lt.u32.totalorder %s819_s6, %s868_s4 }
 0x237   : > { %p649_p11 = scmp.lt.u32.totalorder %s647_s14, %s643_s18  ;;  %p651_p13 = scmp.lt.u32.totalorder %s643_s18, %s819_s6 }
 0x238   : > { %p645_p7 = pnand %p644_p6, %p777_p4 }
 0x239   : > { %p650_p12 = por %p649_p11, %p648_p10 }
 0x23a   : > { %p646_p9 = pneg %p645_p7 }
 0x23b   : > { %p652_p0 = por %p651_p13, %p650_p12 }
 0x23d   : > { %p653_p1 = pnand %p652_p0, %p646_p9 }
 0x23f   : > { %656 = shalt.err (!%p653_p1)
}
 0x240   : > { %568 = dma.vmem_to_hbm [thread:$0]  (%p777_p4), %s411_s26, 128, %s819_s6, %s393_s7   ;;  %vm383_vm3 = vcmask 60416  }
 0x241   : > { %s270_s5 = scalar_lea.vmem %s867_s3, %s794_s30 }
 0x306   : > { %v376_v20 = vpop.f32.mrb[0].mxu1 }
 0x307   : > { %v382_v21 = vpack.c.bf16 %v376_v20, %v376_v20  ;;  %v566_v22 = vpop.f32.mrb[1].mxu1 }
 0x308   : > { %v379_v23 = vpop.f32.mrb[2].mxu1 }
 0x309   : > { %384 = vst.msk [vmem:[%s270_s5] sm:$0xf] %vm383_vm3, %v382_v21  ;;  %v567_v24 = vpop.f32.mrb[3].mxu1 }
 0x30a PF: > { %p574_p2 = scmp.ge.s32.totalorder %s707_s20, 2  ;;  %s432_s25 = sand.u32 1, %s687_s15  }
 0x30b   : > { %s433_s26 = scalar_lea.sflag [#allocation3], %s432_s25 }
 0x30c   : > { %p571_p3 = pnand %p574_p2, %p784_p8 }
 0x30e   : > { %682 = dma.done.wait (!%p571_p3), %s433_s26, 128  }
 0x30f   : > { %684 = vsyncadd (!%p571_p3), %s433_s26, 4294967168  ;;  %s18_s20 = sadd.s32 1, %s707_s20   ;;  %s871_s15 = smov %s691_s16 }
 0x310   : > { %p15_p4 = scmp.ge.s32.totalorder %s18_s20, 10   ;;  %s872_s16 = smov %s695_s17 }
 0x311   : > { %s873_s17 = smov %s790_s28  ;;  %s874_s18 = smov %s703_s19 }
 0x312   : > { %s875_s19 = smov %s877_s23  ;;  %17 = sbr.rel (!%p15_p4) target bundleno = 4 (0x4), region = 85 }
 0x319   :  { %438 = vsyncpa [#allocation3], 1 }
 0x31a   :  { %440 = vsyncpa [#allocation3 + $0x1], 1 }

// kernel: multi_head_attention.5
= control target key start
LH: loop header
LB: loop body
LE: loop exit
PB: predicated region body
PF: predicated region fallthrough
CT: control target
= control target key end

     0   :  { %v221_v1 = vmov 0.0   ;;  %vm222_vm0 = vmmov 0   ;;  %s304_s0 = inlined_call_operand.vmem [shape: bf16[16,32], index: 0, kind: input, shape index: {}]   ;;  %s305_s1 = inlined_call_operand.vmem [shape: f32[16,32], index: 1, kind: input, shape index: {}]   ;;  %s306_s2 = inlined_call_operand.vmem [shape: bf16[32,32], index: 2, kind: input, shape index: {}]   ;;  %s307_s3 = inlined_call_operand.vmem [shape: f32[1,32], index: 3, kind: input, shape index: {}]   ;;  %s308_s4 = inlined_call_operand.vmem [shape: f32[1,32], index: 4, kind: input, shape index: {}]   ;;  %s309_s5 = inlined_call_operand.vmem [shape: f32[1,32], index: 5, kind: input, shape index: {}]   ;;  %s310_s6 = inlined_call_operand.hbm [shape: f32[16,32], index: 6, kind: output, shape index: {}]  }
   0x1   :  { %v190_v0 = vld [vmem:[%s306_s2] sm:$0xff]   ;;  %177 = vmatprep.subr.bf16.mxu0 %v221_v1  ;;  %v191_v2 = vld [vmem:[%s306_s2 + $0x8] sm:$0xff]   ;;  %181 = vmatprep.mubr.msk.bf16.mxu0 %vm222_vm0, %v221_v1 }
   0x2   :  { %178 = vmatpush3.bf16.msra.mxu0 %v190_v0 }
   0x3   :  { %179 = vmatprep.subr.bf16.mxu0 %v221_v1 }
   0x4   :  { %11 = vsyncpa [#allocation3], 0  ;;  %v192_v3 = vld [vmem:[%s304_s0] sm:$0xff]   ;;  %vm55_vm1 = vcmask 261120   ;;  %v101_v10 = vld [vmem:[%s305_s1 + $0x8] sm:$0xff]  ;;  %s223_s9 = smov [#allocation2]  }
   0x5   :  { %v167_v4 = vld [vmem:[%s307_s3] ss:$0 sm:$0xff]  ;;  %s156_s10 = sshll.u32 %s223_s9, 4  ;;  %s157_s10 = int_to_ptr.vmem [resolvable:$true] %s156_s10 }
   0x6   :  { %180 = vmatpush3.bf16.msra.mxu0 %v191_v2  ;;  %v100_v6 = vld [vmem:[%s305_s1] sm:$0xff]  ;;  %s197_s11 = scalar_lea.vmem %s157_s10, 256  ;;  %p202_p1 = scmp.lt.s32.totalorder %s157_s10, %s157_s10 }
   0x7   :  { %v172_v34 = vld [vmem:[%s308_s4] ss:$0 sm:$0xff]  ;;  %p198_p0 = scmp.ne.s32.totalorder %s157_s10, %s197_s11  ;;  %p203_p2 = scmp.lt.s32.totalorder %s197_s11, %s197_s11 }
   0x8   :  { %v173_v36 = vld [vmem:[%s309_s5] ss:$0 sm:$0xff] }
   0x9   :  { %182 = vmatmul.mubr.msk.bf16.vlgmr.msra.gmra.mrb[0].mxu0 %vm55_vm1, %v192_v3  ;;  %p204_p3 = por %p203_p2, %p202_p1 }
   0xb   :  { %p205_p4 = pnand %p204_p3, %p198_p0 }
  0xdc   :  { %v93_v5 = vpop.f32.mrb[0].mxu0 }
  0xdd   :  { %v94_v7 = vadd.f32 %v167_v4, %v93_v5  ;;  %v183_v8 = vpop.f32.mrb[1].mxu0 }
  0xde   :  { %v96_v9 = vpop.f32.mrb[2].mxu0 }
  0xdf   :  { %v97_v11 = vadd.f32 %v167_v4, %v96_v9  ;;  %v184_v12 = vpop.f32.mrb[3].mxu0  ;;  %v102_v13 = vadd.f32 %v100_v6, %v94_v7 }
  0xe1   :  { %v104_v14 = vsel %vm55_vm1, %v102_v13, 0.0  ;;  %v103_v15 = vadd.f32 %v101_v10, %v97_v11 }
  0xe2   :  { %105 = vadd.xlane.f32.xlu0 %v104_v14 }
  0xe3   :  { %v107_v16 = vsel %vm55_vm1, %v103_v15, 0.0 }
  0xe6   :  { %108 = vadd.xlane.f32.xlu0 %v107_v16 }
 0x16f   :  { %v106_v17 = vpop.xlane.xlu0 %105 }
 0x170   :  { %v111_v18 = vmul.f32 0.03125, %v106_v17 }
 0x172   :  { %v113_v19 = vsub.f32 %v102_v13, %v111_v18 }
 0x173   :  { %v109_v20 = vpop.xlane.xlu0 %108 }
 0x174   :  { %v112_v21 = vmul.f32 0.03125, %v109_v20  ;;  %v115_v22 = vmul.f32 %v113_v19, %v113_v19 }
 0x176   :  { %v114_v23 = vsub.f32 %v103_v15, %v112_v21  ;;  %v117_v24 = vsel %vm55_vm1, %v115_v22, 0.0 }
 0x177   :  { %118 = vadd.xlane.f32.xlu1 %v117_v24 }
 0x178   :  { %v116_v25 = vmul.f32 %v114_v23, %v114_v23 }
 0x17a   :  { %v120_v26 = vsel %vm55_vm1, %v116_v25, 0.0 }
 0x17b   :  { %121 = vadd.xlane.f32.xlu1 %v120_v26 }
 0x204   :  { %v119_v27 = vpop.xlane.xlu1 %118 }
 0x205   :  { %v123_v28 = vmul.f32 0.03125, %v119_v27 }
 0x207   :  { %v125_v29 = vadd.f32 1e-05, %v123_v28 }
 0x208   :  { %v122_v30 = vpop.xlane.xlu1 %121 }
 0x209   :  { %193 = vrsqrt.f32 %v125_v29  ;;  %v124_v31 = vmul.f32 0.03125, %v122_v30 }
 0x20b   :  { %v126_v32 = vadd.f32 1e-05, %v124_v31 }
 0x20d   :  { %195 = vrsqrt.f32 %v126_v32 }
 0x213   :  { %v194_v33 = vpop.eup %193 }
 0x214   :  { %v129_v35 = vmul.f32 %v194_v33, %v113_v19 }
 0x216   :  { %v138_v37 = vmul.f32 %v172_v34, %v129_v35 }
 0x217   :  { %v196_v38 = vpop.eup %195 }
 0x218   :  { %v130_v39 = vmul.f32 %v196_v38, %v114_v23  ;;  %v147_v40 = vadd.f32 %v173_v36, %v138_v37 }
 0x21a   :  { %v139_v41 = vmul.f32 %v172_v34, %v130_v39  ;;  %149 = vst.msk [vmem:[#allocation2] sm:$0xff] %vm55_vm1, %v147_v40 }
 0x21c   :  { %v148_v42 = vadd.f32 %v173_v36, %v139_v41 }
 0x21e   :  { %150 = vst.msk [vmem:[#allocation2 + $0x8] sm:$0xff] %vm55_vm1, %v148_v42 }
 0x21f   :  { %208 = shalt.err (!%p205_p4)
}
 0x220   :  { %s209_s12 = scalar_lea.hbm %s310_s6, 256 }
 0x221   :  { %p210_p5 = scmp.ne.s32.totalorder %s310_s6, %s209_s12  ;;  %p213_p6 = scmp.lt.u32.totalorder %s209_s12, %s310_s6 }
 0x223   :  { %p215_p7 = pnand %p213_p6, %p210_p5 }
 0x225   :  { %218 = shalt.err (!%p215_p7)
}
 0x226   :  { %s224_s17 = smov 128   ;;  %s225_s18 = smov 8  }
 0x227   :  { %162 = dma.vmem_to_hbm [thread:$0]  %s157_s10, 256, %s310_s6, [#allocation3], %s224_s17, %s224_s17, %s225_s18  }
 0x228   :  { %219 = dma.done.wait [#allocation3], 256  }
 0x229   :  { %220 = vsyncadd [#allocation3], 4294967040 }
 0x22a   :  { %166 = vsyncpa [#allocation3], 1 }

</bundles_post_ra>
